<compile_context>
chip_gen: v7x
topology: tpu7x:2x2x1
jax: 0.10.0
libtpu: 0.0.40
codegen_flags: <defaults>
</compile_context>

<pallas_src>
import jax
import jax.numpy as jnp
from jax.experimental import pallas as pl
from jax.experimental.pallas import tpu as pltpu


def _make_kernel(Nb, H, W, Cin, Cout, K, pad):
    HW = H * W
    Rows = Nb * Cin
    KK = K * K

    def kernel(x_ref, w2_ref, shift_ref, alpha_ref, o_ref):
        # x_ref:     (Nb, Cin, HW)     activations, spatial flattened onto lanes
        # w2_ref:    (Cout, KK*Cin)    depthwise (x) pointwise (x) BN folded weights
        # shift_ref: (Cout, 1)         folded dw_b / pw_b / BN shift
        # alpha_ref: (1,)  in SMEM     PReLU slope (shared scalar)
        # o_ref:     (Nb, Cout, HW)    lane-dense NCHW output
        #
        # Pack Nb images onto the sublanes so the roll/mask stage uses full
        # vregs even when Cin < 8.  Upcast to f32 (v5e VPU has no bf16 path).
        x = x_ref[...].reshape(Rows, HW).astype(jnp.float32)

        # lane index -> (h, w); boundary masks hoisted out of the tap loops.
        pos = jax.lax.broadcasted_iota(jnp.int32, (1, HW), 1)
        if (W & (W - 1)) == 0:                       # power-of-two fast path
            h = jnp.right_shift(pos, W.bit_length() - 1)
            wcol = jnp.bitwise_and(pos, W - 1)
        else:
            h = pos // W
            wcol = pos % W
        h_ok = {}
        w_ok = {}
        for d in range(-pad, pad + 1):
            h_ok[d] = None if d == 0 else ((h >= -d) if d < 0 else (h < H - d))
            w_ok[d] = None if d == 0 else ((wcol >= -d) if d < 0 else (wcol < W - d))

        # K*K shifted + zero-masked copies of x.  Rolls ride the XLU slot; the
        # per-tap weights live inside w2 (MXU), so there is no per-tap
        # lane-broadcast / FMA chain on the VPU.
        taps = []
        for kh in range(K):
            dh = kh - pad
            for kw in range(K):
                dwo = kw - pad
                d = dh * W + dwo                      # flattened tap offset
                s = x if d == 0 else pltpu.roll(x, shift=(-d) % HW, axis=1)
                mh, mw = h_ok[dh], w_ok[dwo]
                m = mh if mw is None else (mw if mh is None
                                           else jnp.logical_and(mh, mw))
                if m is not None:
                    s = jnp.where(m, s, 0.0)
                taps.append(s)                        # (Rows, HW) each

        w2 = w2_ref[...]                              # (Cout, KK*Cin)
        shift = shift_ref[...]                        # (Cout, 1)
        alpha = alpha_ref[0]
        mxu_dtype = w2.dtype

        # One fused depthwise+pointwise+BN matmul per image on the MXU.
        for n in range(Nb):
            feat = jnp.concatenate(
                [t[n * Cin:(n + 1) * Cin] for t in taps], axis=0)   # (KK*Cin, HW)
            y = jnp.dot(w2, feat.astype(mxu_dtype),
                        preferred_element_type=jnp.float32)          # (Cout, HW)
            y = y + shift
            o_ref[n] = jnp.where(y > 0, y, alpha * y).astype(o_ref.dtype)

    return kernel


def _pick_batch_block(N, bytes_per_image, target_bytes):
    """Images per grid step: biggest divisor of N whose tile fits ~target.

    If the whole batch fits in one step but an even split still keeps tiles
    >= target/2, split so a v7x megacore can balance its two TensorCores
    (single-TC v5e/v6e keep the bigger tile).
    """
    nb = max(1, min(N, target_bytes // max(1, bytes_per_image)))
    while N % nb:
        nb -= 1
    if N // nb == 1 and N > 1:
        for cand in range(nb // 2, 0, -1):
            if (N % cand == 0 and (N // cand) % 2 == 0
                    and cand * bytes_per_image >= target_bytes // 2):
                nb = cand
                break
    return nb


def dwconv2d_bn_prelu(x_nchw, dw_w, dw_b, pw_w, pw_b,
                      gamma, beta, rmean, rvar, alpha, eps=1e-5,
                      io_dtype=jnp.float32, mxu_dtype=jnp.float32,
                      target_tile_bytes=1 << 20):
    """x_nchw: (N, Cin, H, W) float32. Returns (N, Cout, H, W) in io_dtype."""
    N, Cin, H, W = x_nchw.shape
    K = dw_w.shape[0]                     # dw_w: (K, K, Cin)
    Cout = pw_w.shape[1]                  # pw_w: (Cin, Cout)
    pad = (K - 1) // 2
    HW = H * W
    KK = K * K

    # Fold BN + both conv biases:
    #   y[o,s] = sum_{t,c} (pw[c,o]*scale[o]*dw[t,c]) * x_shift_t[c,s] + shift[o]
    scale = gamma / jnp.sqrt(rvar + eps)                          # (Cout,)
    pwf_t = (pw_w * scale[None, :]).T                             # (Cout, Cin)
    shift = (beta - rmean * scale) + scale * (dw_b @ pw_w + pw_b)  # (Cout,)
    dw_flat = dw_w.reshape(KK, Cin)                               # t = kh*K + kw
    w2 = (pwf_t[:, None, :] * dw_flat[None, :, :]).reshape(Cout, KK * Cin)
    w2 = w2.astype(mxu_dtype)

    # Batch blocking: pack Nb images per grid step.
    itemsize = jnp.dtype(io_dtype).itemsize
    bytes_per_image = (Cin + Cout) * HW * itemsize
    Nb = _pick_batch_block(N, bytes_per_image, target_tile_bytes)

    x2d = x_nchw.reshape(N, Cin, HW).astype(io_dtype)   # free reshape, stays NCHW

    # Explicit VMEM budget (double-buffered in/out tiles + f32 intermediates).
    tile_bytes = Nb * (Cin + Cout) * HW * itemsize
    interm_bytes = (KK + 2) * Nb * Cin * HW * 4
    vmem_limit = int(min(48 << 20, max(8 << 20, 4 * tile_bytes + 2 * interm_bytes)))

    kernel = _make_kernel(Nb, H, W, Cin, Cout, K, pad)
    out2d = pl.pallas_call(
        kernel,
        out_shape=jax.ShapeDtypeStruct((N, Cout, HW), io_dtype),
        grid=(N // Nb,),
        in_specs=[
            pl.BlockSpec((Nb, Cin, HW), lambda n: (n, 0, 0)),
            pl.BlockSpec((Cout, KK * Cin), lambda n: (0, 0)),
            pl.BlockSpec((Cout, 1), lambda n: (0, 0)),
            pl.BlockSpec(memory_space=pltpu.MemorySpace.SMEM),
        ],
        out_specs=pl.BlockSpec((Nb, Cout, HW), lambda n: (n, 0, 0)),
        compiler_params=pltpu.CompilerParams(
            dimension_semantics=("parallel",),
            vmem_limit_bytes=vmem_limit),
    )(x2d, w2, shift.reshape(Cout, 1).astype(jnp.float32),
      alpha.astype(jnp.float32))

    return out2d.reshape(N, Cout, H, W)                 # free reshape, already NCHW


def reference(x_nchw, dw_w, dw_b, pw_w, pw_b, gamma, beta, rmean, rvar, alpha, eps=1e-5):
    """Pure-JAX reference (same math as the PyTorch forward, f32)."""
    N, Cin, H, W = x_nchw.shape
    K = dw_w.shape[0]
    pad = (K - 1) // 2
    x = jnp.transpose(x_nchw, (0, 2, 3, 1))
    xp = jnp.pad(x, ((0, 0), (pad, pad), (pad, pad), (0, 0)))
    acc = jnp.zeros((N, H, W, Cin), jnp.float32)
    for dh in range(K):
        for dw in range(K):
            acc = acc + xp[:, dh:dh + H, dw:dw + W, :] * dw_w[dh, dw, :]
    acc = acc + dw_b
    y = acc.reshape(N * H * W, Cin) @ pw_w + pw_b
    scale = gamma / jnp.sqrt(rvar + eps)
    shift = beta - rmean * scale
    y = y * scale + shift
    y = jnp.where(y > 0, y, alpha[0] * y)
    y = y.reshape(N, H, W, -1)
    return jnp.transpose(y, (0, 3, 1, 2))


if __name__ == "__main__":
    N, Cin, Cout, H, W, K = 2, 4, 8, 16, 16, 3

    key = jax.random.PRNGKey(0)
    kx, kdw, kdb, kpw, kpb, kg, kb, km, kv = jax.random.split(key, 9)

    x = jax.random.normal(kx, (N, Cin, H, W), jnp.float32)

    # Deterministic synthetic parameters (shapes per nn.Module __init__).
    dw_w = 0.2 * jax.random.normal(kdw, (K, K, Cin), jnp.float32)     # depthwise weight
    dw_b = 0.1 * jax.random.normal(kdb, (Cin,), jnp.float32)          # depthwise bias
    pw_w = 0.2 * jax.random.normal(kpw, (Cin, Cout), jnp.float32)     # 1x1 conv weight
    pw_b = 0.1 * jax.random.normal(kpb, (Cout,), jnp.float32)         # 1x1 conv bias
    gamma = 1.0 + 0.1 * jax.random.normal(kg, (Cout,), jnp.float32)   # BN weight
    beta = 0.1 * jax.random.normal(kb, (Cout,), jnp.float32)          # BN bias
    rmean = 0.1 * jax.random.normal(km, (Cout,), jnp.float32)         # BN running_mean
    rvar = jnp.abs(1.0 + 0.1 * jax.random.normal(kv, (Cout,), jnp.float32))  # BN running_var
    alpha = jnp.array([0.25], jnp.float32)                            # PReLU default init

    ref = reference(x, dw_w, dw_b, pw_w, pw_b, gamma, beta, rmean, rvar, alpha)

    # f32 end-to-end: faithful to the PyTorch forward, tight tolerance.
    out = dwconv2d_bn_prelu(x, dw_w, dw_b, pw_w, pw_b, gamma, beta, rmean, rvar, alpha)
    out = jax.block_until_ready(out)
    assert out.shape == (N, Cout, H, W)
    assert jnp.allclose(out, ref, atol=1e-4, rtol=1e-4), "f32 mismatch vs reference"

    # bf16 HBM I/O + bf16 MXU operands (v6e/v7x fast path), f32 accumulation.
    out_bf = dwconv2d_bn_prelu(x, dw_w, dw_b, pw_w, pw_b, gamma, beta, rmean, rvar,
                               alpha, io_dtype=jnp.bfloat16, mxu_dtype=jnp.bfloat16)
    out_bf = jax.block_until_ready(out_bf)
    assert jnp.allclose(out_bf.astype(jnp.float32), ref, atol=5e-2, rtol=5e-2), \
        "bf16 mismatch vs reference"

    print("KERNEL_OK")
</pallas_src>

<mosaic_0001>
module attributes {stable_mosaic.version = 11 : i64} {
  func.func @kernel(%arg0: i32, %arg1: memref<2x4x256xf32, #tpu.memory_space<vmem>>, %arg2: memref<8x36xf32, #tpu.memory_space<vmem>>, %arg3: memref<8x1xf32, #tpu.memory_space<vmem>>, %arg4: memref<1xf32, #tpu.memory_space<smem>>, %arg5: memref<2x8x256xf32, #tpu.memory_space<vmem>>) attributes {dimension_semantics = [#tpu.dimension_semantics<parallel>], iteration_bounds = array<i64: 1>, scalar_prefetch = 0 : i64, scratch_operands = 0 : i64, tpu.core_type = #tpu.core_type<tc>, window_params = [{transform_indices = @transform_0, window_bounds = array<i64: 2, 4, 256>}, {pipeline_mode = #tpu.pipeline_mode<synchronous>, transform_indices = @transform_1, window_bounds = array<i64: 8, 36>}, {pipeline_mode = #tpu.pipeline_mode<synchronous>, transform_indices = @transform_2, window_bounds = array<i64: 8, 1>}, {transform_indices = @transform_3, window_bounds = array<i64: 1>}, {transform_indices = @transform_4, window_bounds = array<i64: 2, 8, 256>}]} {
    %c0 = arith.constant 0 : index
    %c0_0 = arith.constant 0 : index
    %c0_1 = arith.constant 0 : index
    %0 = vector.load %arg1[%c0, %c0_0, %c0_1] : memref<2x4x256xf32, #tpu.memory_space<vmem>>, vector<2x4x256xf32>
    %1 = vector.shape_cast %0 : vector<2x4x256xf32> to vector<8x256xf32>
    %2 = tpu.iota {dimensions = array<i32: 1>} : vector<1x256xi32>
    %c4_i32 = arith.constant 4 : i32
    %3 = vector.broadcast %c4_i32 : i32 to vector<1x256xi32>
    %4 = arith.shrsi %2, %3 : vector<1x256xi32>
    %c15_i32 = arith.constant 15 : i32
    %5 = vector.broadcast %c15_i32 : i32 to vector<1x256xi32>
    %6 = arith.andi %2, %5 : vector<1x256xi32>
    %c1_i32 = arith.constant 1 : i32
    %7 = vector.broadcast %c1_i32 : i32 to vector<1x256xi32>
    %8 = arith.cmpi sge, %4, %7 : vector<1x256xi32>
    %c1_i32_2 = arith.constant 1 : i32
    %9 = vector.broadcast %c1_i32_2 : i32 to vector<1x256xi32>
    %10 = arith.cmpi sge, %6, %9 : vector<1x256xi32>
    %c15_i32_3 = arith.constant 15 : i32
    %11 = vector.broadcast %c15_i32_3 : i32 to vector<1x256xi32>
    %12 = arith.cmpi slt, %4, %11 : vector<1x256xi32>
    %c15_i32_4 = arith.constant 15 : i32
    %13 = vector.broadcast %c15_i32_4 : i32 to vector<1x256xi32>
    %14 = arith.cmpi slt, %6, %13 : vector<1x256xi32>
    %c17_i32 = arith.constant 17 : i32
    %15 = tpu.dynamic_rotate %1 by %c17_i32 dim 1 : vector<8x256xf32>, i32 -> vector<8x256xf32>
    %16 = arith.andi %8, %10 : vector<1x256xi1>
    %cst = arith.constant 0.000000e+00 : f32
    %17 = vector.shape_cast %16 : vector<1x256xi1> to vector<1x256xi1>
    %18 = vector.broadcast %17 : vector<1x256xi1> to vector<8x256xi1>
    %19 = vector.broadcast %cst : f32 to vector<8x256xf32>
    %20 = arith.select %18, %15, %19 : vector<8x256xi1>, vector<8x256xf32>
    %c16_i32 = arith.constant 16 : i32
    %21 = tpu.dynamic_rotate %1 by %c16_i32 dim 1 : vector<8x256xf32>, i32 -> vector<8x256xf32>
    %cst_5 = arith.constant 0.000000e+00 : f32
    %22 = vector.shape_cast %8 : vector<1x256xi1> to vector<1x256xi1>
    %23 = vector.broadcast %22 : vector<1x256xi1> to vector<8x256xi1>
    %24 = vector.broadcast %cst_5 : f32 to vector<8x256xf32>
    %25 = arith.select %23, %21, %24 : vector<8x256xi1>, vector<8x256xf32>
    %c15_i32_6 = arith.constant 15 : i32
    %26 = tpu.dynamic_rotate %1 by %c15_i32_6 dim 1 : vector<8x256xf32>, i32 -> vector<8x256xf32>
    %27 = arith.andi %8, %14 : vector<1x256xi1>
    %cst_7 = arith.constant 0.000000e+00 : f32
    %28 = vector.shape_cast %27 : vector<1x256xi1> to vector<1x256xi1>
    %29 = vector.broadcast %28 : vector<1x256xi1> to vector<8x256xi1>
    %30 = vector.broadcast %cst_7 : f32 to vector<8x256xf32>
    %31 = arith.select %29, %26, %30 : vector<8x256xi1>, vector<8x256xf32>
    %c1_i32_8 = arith.constant 1 : i32
    %32 = tpu.dynamic_rotate %1 by %c1_i32_8 dim 1 : vector<8x256xf32>, i32 -> vector<8x256xf32>
    %cst_9 = arith.constant 0.000000e+00 : f32
    %33 = vector.shape_cast %10 : vector<1x256xi1> to vector<1x256xi1>
    %34 = vector.broadcast %33 : vector<1x256xi1> to vector<8x256xi1>
    %35 = vector.broadcast %cst_9 : f32 to vector<8x256xf32>
    %36 = arith.select %34, %32, %35 : vector<8x256xi1>, vector<8x256xf32>
    %c255_i32 = arith.constant 255 : i32
    %37 = tpu.dynamic_rotate %1 by %c255_i32 dim 1 : vector<8x256xf32>, i32 -> vector<8x256xf32>
    %cst_10 = arith.constant 0.000000e+00 : f32
    %38 = vector.shape_cast %14 : vector<1x256xi1> to vector<1x256xi1>
    %39 = vector.broadcast %38 : vector<1x256xi1> to vector<8x256xi1>
    %40 = vector.broadcast %cst_10 : f32 to vector<8x256xf32>
    %41 = arith.select %39, %37, %40 : vector<8x256xi1>, vector<8x256xf32>
    %c241_i32 = arith.constant 241 : i32
    %42 = tpu.dynamic_rotate %1 by %c241_i32 dim 1 : vector<8x256xf32>, i32 -> vector<8x256xf32>
    %43 = arith.andi %12, %10 : vector<1x256xi1>
    %cst_11 = arith.constant 0.000000e+00 : f32
    %44 = vector.shape_cast %43 : vector<1x256xi1> to vector<1x256xi1>
    %45 = vector.broadcast %44 : vector<1x256xi1> to vector<8x256xi1>
    %46 = vector.broadcast %cst_11 : f32 to vector<8x256xf32>
    %47 = arith.select %45, %42, %46 : vector<8x256xi1>, vector<8x256xf32>
    %c240_i32 = arith.constant 240 : i32
    %48 = tpu.dynamic_rotate %1 by %c240_i32 dim 1 : vector<8x256xf32>, i32 -> vector<8x256xf32>
    %cst_12 = arith.constant 0.000000e+00 : f32
    %49 = vector.shape_cast %12 : vector<1x256xi1> to vector<1x256xi1>
    %50 = vector.broadcast %49 : vector<1x256xi1> to vector<8x256xi1>
    %51 = vector.broadcast %cst_12 : f32 to vector<8x256xf32>
    %52 = arith.select %50, %48, %51 : vector<8x256xi1>, vector<8x256xf32>
    %c239_i32 = arith.constant 239 : i32
    %53 = tpu.dynamic_rotate %1 by %c239_i32 dim 1 : vector<8x256xf32>, i32 -> vector<8x256xf32>
    %54 = arith.andi %12, %14 : vector<1x256xi1>
    %cst_13 = arith.constant 0.000000e+00 : f32
    %55 = vector.shape_cast %54 : vector<1x256xi1> to vector<1x256xi1>
    %56 = vector.broadcast %55 : vector<1x256xi1> to vector<8x256xi1>
    %57 = vector.broadcast %cst_13 : f32 to vector<8x256xf32>
    %58 = arith.select %56, %53, %57 : vector<8x256xi1>, vector<8x256xf32>
    %c0_14 = arith.constant 0 : index
    %c0_15 = arith.constant 0 : index
    %59 = vector.load %arg2[%c0_14, %c0_15] : memref<8x36xf32, #tpu.memory_space<vmem>>, vector<8x36xf32>
    %c0_16 = arith.constant 0 : index
    %c0_17 = arith.constant 0 : index
    %60 = vector.load %arg3[%c0_16, %c0_17] : memref<8x1xf32, #tpu.memory_space<vmem>>, vector<8x1xf32>
    %c0_18 = arith.constant 0 : index
    %61 = memref.load %arg4[%c0_18] : memref<1xf32, #tpu.memory_space<smem>>
    %62 = vector.extract_strided_slice %20 {offsets = [0, 0], sizes = [4, 256], strides = [1, 1]} : vector<8x256xf32> to vector<4x256xf32>
    %63 = vector.extract_strided_slice %25 {offsets = [0, 0], sizes = [4, 256], strides = [1, 1]} : vector<8x256xf32> to vector<4x256xf32>
    %64 = vector.extract_strided_slice %31 {offsets = [0, 0], sizes = [4, 256], strides = [1, 1]} : vector<8x256xf32> to vector<4x256xf32>
    %65 = vector.extract_strided_slice %36 {offsets = [0, 0], sizes = [4, 256], strides = [1, 1]} : vector<8x256xf32> to vector<4x256xf32>
    %66 = vector.extract_strided_slice %1 {offsets = [0, 0], sizes = [4, 256], strides = [1, 1]} : vector<8x256xf32> to vector<4x256xf32>
    %67 = vector.extract_strided_slice %41 {offsets = [0, 0], sizes = [4, 256], strides = [1, 1]} : vector<8x256xf32> to vector<4x256xf32>
    %68 = vector.extract_strided_slice %47 {offsets = [0, 0], sizes = [4, 256], strides = [1, 1]} : vector<8x256xf32> to vector<4x256xf32>
    %69 = vector.extract_strided_slice %52 {offsets = [0, 0], sizes = [4, 256], strides = [1, 1]} : vector<8x256xf32> to vector<4x256xf32>
    %70 = vector.extract_strided_slice %58 {offsets = [0, 0], sizes = [4, 256], strides = [1, 1]} : vector<8x256xf32> to vector<4x256xf32>
    %71 = tpu.concatenate %62, %63, %64, %65, %66, %67, %68, %69, %70 in 0 : vector<4x256xf32>, vector<4x256xf32>, vector<4x256xf32>, vector<4x256xf32>, vector<4x256xf32>, vector<4x256xf32>, vector<4x256xf32>, vector<4x256xf32>, vector<4x256xf32> -> vector<36x256xf32>
    %cst_19 = arith.constant dense<0.000000e+00> : vector<8x256xf32>
    %72 = tpu.matmul %59, %71, %cst_19 {dimension_numbers = #tpu.dot_dimension_numbers<[1], [0], [0], [1], [0, 0, 1, 1], [], []>} : vector<8x36xf32>, vector<36x256xf32>, vector<8x256xf32> -> vector<8x256xf32>
    %73 = vector.broadcast %60 : vector<8x1xf32> to vector<8x256xf32>
    %74 = arith.addf %72, %73 : vector<8x256xf32>
    %cst_20 = arith.constant 0.000000e+00 : f32
    %75 = vector.broadcast %cst_20 : f32 to vector<8x256xf32>
    %76 = arith.cmpf ogt, %74, %75 : vector<8x256xf32>
    %77 = vector.broadcast %61 : f32 to vector<8x256xf32>
    %78 = arith.mulf %77, %74 : vector<8x256xf32>
    %79 = arith.select %76, %74, %78 : vector<8x256xi1>, vector<8x256xf32>
    %c0_21 = arith.constant 0 : index
    %c0_22 = arith.constant 0 : index
    %c0_23 = arith.constant 0 : index
    %80 = vector.load %arg5[%c0_21, %c0_22, %c0_23] : memref<2x8x256xf32, #tpu.memory_space<vmem>>, vector<1x8x256xf32>
    %81 = vector.shape_cast %80 : vector<1x8x256xf32> to vector<8x256xf32>
    %82 = vector.shape_cast %79 : vector<8x256xf32> to vector<1x8x256xf32>
    tpu.vector_store %arg5[%c0_21, %c0_22, %c0_23], %82 {strides = array<i32>} : memref<2x8x256xf32, #tpu.memory_space<vmem>>, vector<1x8x256xf32>,
    %83 = vector.extract_strided_slice %20 {offsets = [4, 0], sizes = [4, 256], strides = [1, 1]} : vector<8x256xf32> to vector<4x256xf32>
    %84 = vector.extract_strided_slice %25 {offsets = [4, 0], sizes = [4, 256], strides = [1, 1]} : vector<8x256xf32> to vector<4x256xf32>
    %85 = vector.extract_strided_slice %31 {offsets = [4, 0], sizes = [4, 256], strides = [1, 1]} : vector<8x256xf32> to vector<4x256xf32>
    %86 = vector.extract_strided_slice %36 {offsets = [4, 0], sizes = [4, 256], strides = [1, 1]} : vector<8x256xf32> to vector<4x256xf32>
    %87 = vector.extract_strided_slice %1 {offsets = [4, 0], sizes = [4, 256], strides = [1, 1]} : vector<8x256xf32> to vector<4x256xf32>
    %88 = vector.extract_strided_slice %41 {offsets = [4, 0], sizes = [4, 256], strides = [1, 1]} : vector<8x256xf32> to vector<4x256xf32>
    %89 = vector.extract_strided_slice %47 {offsets = [4, 0], sizes = [4, 256], strides = [1, 1]} : vector<8x256xf32> to vector<4x256xf32>
    %90 = vector.extract_strided_slice %52 {offsets = [4, 0], sizes = [4, 256], strides = [1, 1]} : vector<8x256xf32> to vector<4x256xf32>
    %91 = vector.extract_strided_slice %58 {offsets = [4, 0], sizes = [4, 256], strides = [1, 1]} : vector<8x256xf32> to vector<4x256xf32>
    %92 = tpu.concatenate %83, %84, %85, %86, %87, %88, %89, %90, %91 in 0 : vector<4x256xf32>, vector<4x256xf32>, vector<4x256xf32>, vector<4x256xf32>, vector<4x256xf32>, vector<4x256xf32>, vector<4x256xf32>, vector<4x256xf32>, vector<4x256xf32> -> vector<36x256xf32>
    %cst_24 = arith.constant dense<0.000000e+00> : vector<8x256xf32>
    %93 = tpu.matmul %59, %92, %cst_24 {dimension_numbers = #tpu.dot_dimension_numbers<[1], [0], [0], [1], [0, 0, 1, 1], [], []>} : vector<8x36xf32>, vector<36x256xf32>, vector<8x256xf32> -> vector<8x256xf32>
    %94 = vector.broadcast %60 : vector<8x1xf32> to vector<8x256xf32>
    %95 = arith.addf %93, %94 : vector<8x256xf32>
    %cst_25 = arith.constant 0.000000e+00 : f32
    %96 = vector.broadcast %cst_25 : f32 to vector<8x256xf32>
    %97 = arith.cmpf ogt, %95, %96 : vector<8x256xf32>
    %98 = vector.broadcast %61 : f32 to vector<8x256xf32>
    %99 = arith.mulf %98, %95 : vector<8x256xf32>
    %100 = arith.select %97, %95, %99 : vector<8x256xi1>, vector<8x256xf32>
    %c1 = arith.constant 1 : index
    %c0_26 = arith.constant 0 : index
    %c0_27 = arith.constant 0 : index
    %101 = vector.load %arg5[%c1, %c0_26, %c0_27] : memref<2x8x256xf32, #tpu.memory_space<vmem>>, vector<1x8x256xf32>
    %102 = vector.shape_cast %101 : vector<1x8x256xf32> to vector<8x256xf32>
    %103 = vector.shape_cast %100 : vector<8x256xf32> to vector<1x8x256xf32>
    tpu.vector_store %arg5[%c1, %c0_26, %c0_27], %103 {strides = array<i32>} : memref<2x8x256xf32, #tpu.memory_space<vmem>>, vector<1x8x256xf32>,
    return
  }
  func.func @transform_0(%arg0: i32) -> (i32, i32, i32) {
    %c0_i32 = arith.constant 0 : i32
    %c0_i32_0 = arith.constant 0 : i32
    %c0_i32_1 = arith.constant 0 : i32
    return %arg0, %c0_i32, %c0_i32_0 : i32, i32, i32
  }
  func.func @transform_1(%arg0: i32) -> (i32, i32) {
    %c0_i32 = arith.constant 0 : i32
    %c0_i32_0 = arith.constant 0 : i32
    %c0_i32_1 = arith.constant 0 : i32
    return %c0_i32, %c0_i32_0 : i32, i32
  }
  func.func @transform_2(%arg0: i32) -> (i32, i32) {
    %c0_i32 = arith.constant 0 : i32
    %c0_i32_0 = arith.constant 0 : i32
    %c0_i32_1 = arith.constant 0 : i32
    return %c0_i32, %c0_i32_0 : i32, i32
  }
  func.func @transform_3(%arg0: i32) -> i32 {
    %c0_i32 = arith.constant 0 : i32
    %c0_i32_0 = arith.constant 0 : i32
    return %c0_i32 : i32
  }
  func.func @transform_4(%arg0: i32) -> (i32, i32, i32) {
    %c0_i32 = arith.constant 0 : i32
    %c0_i32_0 = arith.constant 0 : i32
    %c0_i32_1 = arith.constant 0 : i32
    return %arg0, %c0_i32, %c0_i32_0 : i32, i32, i32
  }
}

</mosaic_0001>

<bundles_post_ra>
// kernel: tpu_custom_call.1
= control target key start
LH: loop header
LB: loop body
LE: loop exit
PB: predicated region body
PF: predicated region fallthrough
CT: control target
= control target key end

     0   :  { %10 = vsyncpa [#allocation4], 0  ;;  %s823_s0 = inlined_call_operand.hbm [shape: f32[2,4,256], index: 0, kind: input, shape index: {}]   ;;  %s824_s1 = inlined_call_operand.vmem [shape: f32[8,36], index: 1, kind: input, shape index: {}]   ;;  %s825_s2 = inlined_call_operand.vmem [shape: f32[8,1], index: 2, kind: input, shape index: {}]   ;;  %s826_s3 = inlined_call_operand.<no memory space> [shape: f32[1], index: 3, kind: input, shape index: {}]   ;;  %s827_s4 = inlined_call_operand.hbm [shape: f32[2,8,256], index: 4, kind: output, shape index: {}]  }
   0x1   :  { %11 = vsyncpa [#allocation5], 0  ;;  %s558_s15 = smov [#allocation3]   ;;  %s510_s19 = scalar_lea.hbm %s823_s0, 256 }
   0x2   :  { %s17_s16 = sshll.u32 %s558_s15, 4  ;;  %p511_p0 = scmp.ne.s32.totalorder %s823_s0, %s510_s19  ;;  %s18_s16 = int_to_ptr.vmem [resolvable:$true] %s17_s16 }
   0x3   :  { %p514_p1 = scmp.lt.u32.totalorder %s510_s19, %s823_s0 }
   0x5   :  { %p516_p2 = pnand %p514_p1, %p511_p0 }
   0x7   :  { %519 = shalt.err (!%p516_p2)
}
   0x8   :  { %s520_s24 = scalar_lea.vmem %s18_s16, 256  ;;  %p525_p4 = scmp.lt.s32.totalorder %s18_s16, %s18_s16 }
   0x9   :  { %p521_p3 = scmp.ne.s32.totalorder %s18_s16, %s520_s24  ;;  %p526_p5 = scmp.lt.s32.totalorder %s520_s24, %s520_s24 }
   0xb   :  { %p527_p6 = por %p526_p5, %p525_p4 }
   0xd   :  { %p528_p7 = pnand %p527_p6, %p521_p3 }
   0xf   :  { %531 = shalt.err (!%p528_p7)
}
  0x10   :  { %s559_s25 = smov 128   ;;  %s560_s26 = smov 8  }
  0x11   :  { %23 = dma.hbm_to_vmem [thread:$0]  %s823_s0, 256, %s18_s16, [#allocation4], %s559_s25, %s559_s25, %s560_s26  }
  0x12   :  { %554 = dma.done.wait [#allocation4], 256  }
  0x13   :  { %555 = vsyncadd [#allocation4], 4294967040  ;;  %v610_v0 = vld [vmem:[#allocation3] sm:$0xff]  ;;  %v612_v1 = vld [vmem:[#allocation3 + $0x8] sm:$0xff]  ;;  %s561_s29 = smov 15   ;;  %s562_s30 = smov 17   ;;  %v35_v8 = vlaneseq }
  0x14   :  { %v52_v2 = vcombine.low %v610_v0, %v612_v1  ;;  %v53_v3 = vcombine.high %v610_v0, %v612_v1  ;;  %s563_s5 = smov 1   ;;  %s564_s0 = smov 16   ;;  %v569_v5 = vmov 0.0   ;;  %v169_v6 = vld [vmem:[%s825_s2] sm:$0xff]  ;;  %v570_v7 = vmov 0  }
  0x15   :  { %s565_s6 = smov 127   ;;  %s566_s7 = smov 113   ;;  %399 = vmatprep.mubr.f32.mxu1 %v569_v5  ;;  %285 = vmatprep.mubr.f32.mxu0 %v569_v5  ;;  %v622_v9 = vand.u32 127, %v35_v8  ;;  %v313_v29 = vcombine.high %v612_v1, %v612_v1  ;;  %v183_v30 = vcombine.high %v610_v0, %v610_v0 }
  0x16   :  { %v479_v4 = vpack.i.bf16 %v53_v3, %v52_v2  ;;  %s567_s8 = smov 112   ;;  %s568_s9 = smov 111   ;;  %504 = vset.pattern.permute.xlu1 %v570_v7  ;;  %505 = vset.pattern.permute.xlu0 %v570_v7 }
  0x17   :  { %v37_v10 = vadd.s32 128, %v622_v9  ;;  %v38_v11 = vshra.s32 %v622_v9, 4  ;;  %v40_v12 = vand.u32 15, %v622_v9  ;;  %vm88_vm7 = vcmp.lt.s32.totalorder %v622_v9, 15 }
  0x18   :  { %480 = vrot.lane.b32.xlu1 %v479_v4, %s561_s29  ;;  %470 = vrot.lane.b32.xlu0 %v479_v4, %s562_s30  ;;  %vm60_vm8 = vcmp.lt.s32.totalorder %v622_v9, 17  ;;  %vm103_vm14 = vcmp.lt.s32.totalorder %v622_v9, 1  ;;  %vm144_vm15 = vcmp.lt.s32.totalorder %v622_v9, 112 }
  0x19   :  { %v39_v13 = vshra.s32 %v37_v10, 4  ;;  %v41_v14 = vand.u32 15, %v37_v10  ;;  %vm627_vm0 = vcmp.ge.s32.totalorder %v38_v11, 1  ;;  %vm631_vm1 = vcmp.ge.s32.totalorder %v40_v12, 1 }
  0x1a   :  { %vm647_vm5 = vcmp.lt.s32.totalorder %v40_v12, 15  ;;  %vm63_vm6 = vmand %vm627_vm0, %vm631_vm1  ;;  %vm673_vm11 = vcmp.lt.s32.totalorder %v38_v11, 15 }
  0x1b   :  { %vm635_vm2 = vcmp.ge.s32.totalorder %v39_v13, 1  ;;  %vm639_vm3 = vcmp.ge.s32.totalorder %v41_v14, 1  ;;  %vm643_vm4 = vcmp.lt.s32.totalorder %v41_v14, 15  ;;  %vm91_vm10 = vmand %vm627_vm0, %vm647_vm5  ;;  %vm677_vm12 = vcmp.lt.s32.totalorder %v39_v13, 15 }
  0x1c   :  { %485 = vrot.lane.b32.xlu1 %v479_v4, %s563_s5  ;;  %475 = vrot.lane.b32.xlu0 %v479_v4, %s564_s0  ;;  %vm64_vm9 = vmand %vm635_vm2, %vm639_vm3 }
  0x1d   :  { %vm92_vm13 = vmand %vm635_vm2, %vm643_vm4 }
  0x20   :  { %490 = vrot.lane.b32.xlu0 %v479_v4, %s565_s6  ;;  %495 = vrot.lane.b32.xlu1 %v479_v4, %s566_s7 }
  0x24   :  { %500 = vrot.lane.b32.xlu0 %v479_v4, %s567_s8  ;;  %153 = vrot.lane.b32.xlu1 %v52_v2, %s568_s9 }
  0x28   :  { %155 = vrot.lane.b32.xlu0 %v53_v3, %s568_s9  ;;  %208 = vperm.xlu1 %504, %v169_v6  }
  0x8a   :  { %v481_v21 = vpop.permute.xlu1 %480  ;;  %v471_v22 = vpop.permute.xlu0 %470 }
  0x8b   :  { %v483_v23 = vunpack.i.h.bf16 %v481_v21  ;;  %v482_v24 = vunpack.i.l.bf16 %v481_v21  ;;  %v473_v25 = vunpack.i.h.bf16 %v471_v22  ;;  %v472_v26 = vunpack.i.l.bf16 %v471_v22 }
  0x8d   :  { %v89_v31 = vsel %vm88_vm7, %v482_v24, %v483_v23  ;;  %v90_v32 = vsel %vm88_vm7, %v483_v23, %v482_v24  ;;  %v61_v33 = vsel %vm60_vm8, %v472_v26, %v473_v25  ;;  %v62_v34 = vsel %vm60_vm8, %v473_v25, %v472_v26 }
  0x8e   :  { %v486_v35 = vpop.permute.xlu1 %485  ;;  %v476_v36 = vpop.permute.xlu0 %475  ;;  %v70_v37 = vsel %vm64_vm9, %v61_v33, 0.0  ;;  %v98_v38 = vsel %vm92_vm13, %v89_v31, 0.0  ;;  %v69_v39 = vsel %vm63_vm6, %v62_v34, 0.0  ;;  %v97_v40 = vsel %vm91_vm10, %v90_v32, 0.0 }
  0x8f   :  { %v488_v41 = vunpack.i.h.bf16 %v486_v35  ;;  %v487_v42 = vunpack.i.l.bf16 %v486_v35  ;;  %v478_v43 = vunpack.i.h.bf16 %v476_v36  ;;  %v477_v44 = vunpack.i.l.bf16 %v476_v36 }
  0x90   :  { %v304_v45 = vrot.slane %v70_v37, 4  ;;  %v310_v46 = vrot.slane %v98_v38, 4  ;;  %v303_v47 = vrot.slane %v69_v39, 4  ;;  %v309_v48 = vrot.slane %v97_v40, 4 }
  0x91   :  { %vm157_vm7 = vcmp.lt.s32.totalorder %v622_v9, 111  ;;  %vm844_vm8 = vcmp.lt.s32.totalorder %v622_v9, 16  ;;  %v104_v50 = vsel %vm103_vm14, %v487_v42, %v488_v41  ;;  %v105_v52 = vsel %vm103_vm14, %v488_v41, %v487_v42 }
  0x92   :  { %v76_v49 = vsel %vm844_vm8, %v477_v44, %v478_v43  ;;  %vm845_vm9 = vmmov %vm844_vm8  ;;  %v491_v53 = vpop.permute.xlu0 %490  ;;  %v496_v54 = vpop.permute.xlu1 %495  ;;  %v111_v56 = vsel %vm639_vm3, %v104_v50, 0.0  ;;  %v110_v58 = vsel %vm631_vm1, %v105_v52, 0.0  ;;  %vm846_vm6 = vcmask 1043456  }
  0x93   :  { %v77_v51 = vsel %vm845_vm9, %v478_v43, %v477_v44  ;;  %v83_v55 = vsel %vm635_vm2, %v76_v49, 0.0  ;;  %v493_v59 = vunpack.i.h.bf16 %v491_v53  ;;  %v492_v60 = vunpack.i.l.bf16 %v491_v53  ;;  %vm847_vm10 = vmmov %vm846_vm6 }
  0x94   :  { %v82_v57 = vsel %vm627_vm0, %v77_v51, 0.0  ;;  %v498_v61 = vunpack.i.h.bf16 %v496_v54  ;;  %v497_v62 = vunpack.i.l.bf16 %v496_v54  ;;  %v174_v63 = vrot.slane %v83_v55, 4  ;;  %vm852_vm8 = vmmov %vm846_vm6 }
  0x95   :  { %v180_v2 = vrot.slane %v111_v56, 4  ;;  %v324_v3 = vsel %vm846_vm6, %v304_v45, %v83_v55  ;;  %v326_v4 = vsel %vm847_vm10, %v310_v46, %v111_v56  ;;  %vm848_vm2 = vcmp.lt.s32.totalorder %v622_v9, 127  ;;  %vm132_vm9 = vmand %vm673_vm11, %vm631_vm1 }
  0x96   :  { %v117_v5 = vsel %vm848_vm2, %v492_v60, %v493_v59  ;;  %vm849_vm13 = vmmov %vm848_vm2  ;;  %vm850_vm0 = vcmp.lt.s32.totalorder %v622_v9, 113  ;;  %v501_v10 = vpop.permute.xlu0 %500  ;;  %v446_v11 = vpack.c.bf16 %v326_v4, %v324_v3  ;;  %v173_v12 = vrot.slane %v82_v57, 4  ;;  %v154_v31 = vpop.permute.xlu1 %153 }
  0x97   :  { %v118_v6 = vsel %vm849_vm13, %v493_v59, %v492_v60  ;;  %v130_v7 = vsel %vm850_vm0, %v497_v62, %v498_v61  ;;  %vm851_vm14 = vmmov %vm850_vm0  ;;  %v179_v13 = vrot.slane %v110_v58, 4  ;;  %v323_v14 = vsel %vm852_vm8, %v303_v47, %v82_v57 }
  0x98   :  { %v131_v8 = vsel %vm851_vm14, %v498_v61, %v497_v62  ;;  %v503_v15 = vunpack.i.h.bf16 %v501_v10  ;;  %v502_v17 = vunpack.i.l.bf16 %v501_v10  ;;  %v325_v21 = vsel %vm846_vm6, %v309_v48, %v110_v58  ;;  %vm853_vm10 = vmmov %vm846_vm6  ;;  %447 = vmatprep.subr.bf16.mxu1 %v446_v11 }
  0x99   :  { %v199_v22 = vsel %vm853_vm10, %v70_v37, %v174_v63  ;;  %vm133_vm2 = vmand %vm677_vm12, %vm639_vm3  ;;  %v448_v23 = vpack.c.bf16 %v325_v21, %v323_v14  ;;  %v138_v35 = vsel %vm132_vm9, %v130_v7, 0.0  ;;  %v123_v9 = vsel %vm647_vm5, %v117_v5, 0.0 }
  0x9a   :  { %vm854_vm13 = vmmov %vm846_vm6  ;;  %v145_v18 = vsel %vm144_vm15, %v502_v17, %v503_v15  ;;  %v146_v32 = vsel %vm144_vm15, %v503_v15, %v502_v17  ;;  %v139_v36 = vsel %vm133_vm2, %v131_v8, 0.0  ;;  %v156_v37 = vpop.permute.xlu0 %155  ;;  %v187_v48 = vrot.slane %v123_v9, 4 }
  0x9b   :  { %v201_v24 = vsel %vm854_vm13, %v98_v38, %v180_v2  ;;  %vm855_vm0 = vmmov %vm846_vm6  ;;  %449 = vmatpush1.bf16.msra.mxu1 %v448_v23  ;;  %v124_v38 = vsel %vm643_vm4, %v118_v6, 0.0  ;;  %v159_v41 = vsel %vm157_vm7, %v156_v37, %v154_v31  ;;  %v318_v44 = vrot.slane %v139_v36, 4 }
  0x9c   :  { %v198_v25 = vsel %vm855_vm0, %v69_v39, %v173_v12  ;;  %vm856_vm14 = vmmov %vm855_vm0  ;;  %v438_v33 = vpack.c.bf16 %v201_v24, %v199_v22  ;;  %v152_v39 = vsel %vm677_vm12, %v146_v32, 0.0  ;;  %v188_v42 = vrot.slane %v124_v38, 4 }
  0x9d   :  { %v200_v26 = vsel %vm856_vm14, %v97_v40, %v179_v13  ;;  %vm160_vm8 = vmand %vm673_vm11, %vm647_vm5  ;;  %v158_v40 = vsel %vm157_vm7, %v154_v31, %v156_v37  ;;  %v194_v43 = vrot.slane %v152_v39, 4  ;;  %v151_v46 = vsel %vm673_vm11, %v145_v18, 0.0 }
  0x9e   :  { %v440_v34 = vpack.c.bf16 %v200_v26, %v198_v25  ;;  %vm161_vm3 = vmand %vm677_vm12, %vm643_vm4  ;;  %439 = vmatprep.subr.bf16.mxu0 %v438_v33  ;;  %v166_v16 = vsel %vm160_vm8, %v158_v40, 0.0  ;;  %v193_v49 = vrot.slane %v151_v46, 4  ;;  %v317_v50 = vrot.slane %v138_v35, 4 }
  0x9f   :  { %v167_v19 = vsel %vm161_vm3, %v159_v41, 0.0  ;;  %vm857_vm1 = vmmov %vm855_vm0  ;;  %vm211_vm2 = vcmask 293888   ;;  %v294_v58 = vstv %s826_s3 }
  0xa0   :  { %441 = vmatpush1.bf16.msra.mxu0 %v440_v34  ;;  %v322_v28 = vrot.slane %v167_v19, 4  ;;  %v328_v45 = vsel %vm857_vm1, %v313_v29, %v124_v38  ;;  %vm858_vm4 = vmmov %vm855_vm0 }
  0xa1   :  { %v330_v47 = vsel %vm858_vm4, %v318_v44, %v152_v39  ;;  %vm859_vm12 = vmmov %vm855_vm0 }
  0xa2   :  { %v450_v51 = vpack.c.bf16 %v330_v47, %v328_v45  ;;  %v327_v52 = vsel %vm859_vm12, %v612_v1, %v123_v9  ;;  %vm860_vm15 = vmmov %vm855_vm0  ;;  %v321_v1 = vrot.slane %v166_v16, 4 }
  0xa3   :  { %v203_v29 = vsel %vm860_vm15, %v183_v30, %v188_v42  ;;  %vm861_vm7 = vmmov %vm855_vm0  ;;  %v168_v30 = vld [vmem:[%s824_s1] sm:$0xff]  ;;  %s571_s1 = smov [#allocation6]  }
  0xa4   :  { %v205_v20 = vsel %vm861_vm7, %v139_v36, %v194_v43  ;;  %vm862_vm5 = vmmov %vm855_vm0  ;;  %451 = vmatprep.subr.bf16.mxu1 %v450_v51  ;;  %s420_s15 = sshll.u32 %s571_s1, 4  ;;  %s421_s15 = int_to_ptr.vmem [resolvable:$true] %s420_s15 }
  0xa5   :  { %v329_v53 = vsel %vm862_vm5, %v317_v50, %v151_v46  ;;  %v442_v27 = vpack.c.bf16 %v205_v20, %v203_v29  ;;  %vm863_vm11 = vmmov %vm855_vm0  ;;  %s532_s3 = scalar_lea.vmem %s421_s15, 512  ;;  %p537_p9 = scmp.lt.s32.totalorder %s421_s15, %s421_s15 }
  0xa6   :  { %v202_v54 = vsel %vm863_vm11, %v610_v0, %v187_v48  ;;  %vm864_vm9 = vmmov %vm855_vm0  ;;  %v452_v56 = vpack.c.bf16 %v329_v53, %v327_v52  ;;  %p533_p8 = scmp.ne.s32.totalorder %s421_s15, %s532_s3  ;;  %p538_p10 = scmp.lt.s32.totalorder %s532_s3, %s532_s3 }
  0xa7   :  { %v204_v55 = vsel %vm864_vm9, %v138_v35, %v193_v49  ;;  %443 = vmatprep.subr.bf16.mxu0 %v442_v27  ;;  %vm865_vm6 = vmmov %vm855_vm0  ;;  %v209_v0 = vpop.permute.xlu1 %208 }
  0xa8   :  { %v444_v57 = vpack.c.bf16 %v204_v55, %v202_v54  ;;  %453 = vmatpush1.bf16.msra.mxu1 %v452_v56  ;;  %vm866_vm10 = vmmov %vm855_vm0  ;;  %p539_p11 = por %p538_p10, %p537_p9 }
  0xa9   :  { %435 = vmatprep.subr.msk.mxu1 %vm866_vm10, %v322_v28  ;;  %vm867_vm13 = vmmov %vm855_vm0 }
  0xaa   :  { %445 = vmatpush1.bf16.msra.mxu0 %v444_v57  ;;  %p540_p12 = pnand %p539_p11, %p533_p8 }
  0xab   :  { %432 = vmatprep.subr.msk.mxu0 %vm865_vm6, %v167_v19 }
  0xac   :  { %436 = vmatpush1.msk.msra.mxu1 %vm867_vm13, %v321_v1 }
  0xad   :  { %437 = vmatmul.mubr.msk.f32.vlgmr.msra.gmra.mrb[0].mxu1 %vm211_vm2, %v168_v30 }
  0xae   :  { %433 = vmatpush1.msk.msra.mxu0 %vm855_vm0, %v166_v16 }
  0xaf   :  { %434 = vmatmul.mubr.msk.f32.vlgmr.msra.gmra.mrb[0].mxu0 %vm211_vm2, %v168_v30 }
 0x180   :  { %v401_v59 = vpop.f32.mrb[0].mxu1 }
 0x181   :  { %v402_v61 = vadd.f32 %v401_v59, %v209_v0  ;;  %v403_v62 = vpop.f32.mrb[1].mxu1 }
 0x182   :  { %v287_v60 = vpop.f32.mrb[0].mxu0  ;;  %v404_v3 = vadd.f32 %v403_v62, %v209_v0 }
 0x183   :  { %v288_v63 = vadd.f32 %v287_v60, %v209_v0  ;;  %v289_v2 = vpop.f32.mrb[1].mxu0  ;;  %vm406_vm14 = vcmp.gt.f32.partialorder %v402_v61, 0.0  ;;  %v408_v5 = vmul.f32 %v402_v61, %v294_v58 }
 0x184   :  { %v290_v4 = vadd.f32 %v289_v2, %v209_v0  ;;  %vm407_vm3 = vcmp.gt.f32.partialorder %v404_v3, 0.0  ;;  %v409_v7 = vmul.f32 %v404_v3, %v294_v58 }
 0x185   :  { %vm292_vm8 = vcmp.gt.f32.partialorder %v288_v63, 0.0  ;;  %v295_v6 = vmul.f32 %v294_v58, %v288_v63  ;;  %v410_v10 = vsel %vm406_vm14, %v402_v61, %v408_v5 }
 0x186   :  { %vm293_vm1 = vcmp.gt.f32.partialorder %v290_v4, 0.0  ;;  %v296_v8 = vmul.f32 %v294_v58, %v290_v4  ;;  %413 = vst [vmem:[#allocation6 + $0x10] sm:$0xff] %v410_v10  ;;  %v411_v12 = vsel %vm407_vm3, %v404_v3, %v409_v7 }
 0x187   :  { %v297_v11 = vsel %vm292_vm8, %v288_v63, %v295_v6  ;;  %414 = vst [vmem:[#allocation6 + $0x18] sm:$0xff] %v411_v12 }
 0x188   :  { %299 = vst [vmem:[#allocation6] sm:$0xff] %v297_v11  ;;  %v298_v13 = vsel %vm293_vm1, %v290_v4, %v296_v8 }
 0x189   :  { %300 = vst [vmem:[#allocation6 + $0x8] sm:$0xff] %v298_v13 }
 0x18a   :  { %543 = shalt.err (!%p540_p12)
}
 0x18b   :  { %s544_s18 = scalar_lea.hbm %s827_s4, 512 }
 0x18c   :  { %p545_p13 = scmp.ne.s32.totalorder %s827_s4, %s544_s18  ;;  %p548_p0 = scmp.lt.u32.totalorder %s544_s18, %s827_s4 }
 0x18e   :  { %p550_p1 = pnand %p548_p0, %p545_p13 }
 0x190   :  { %553 = shalt.err (!%p550_p1)
}
 0x191   :  { %s572_s23 = smov 256  }
 0x192   :  { %426 = dma.vmem_to_hbm [thread:$0]  %s421_s15, 512, %s827_s4, [#allocation5], %s572_s23, %s572_s23, %s564_s0  }
 0x193   :  { %556 = dma.done.wait [#allocation5], 512  }
 0x194   :  { %557 = vsyncadd [#allocation5], 4294966784 }
 0x195   :  { %430 = vsyncpa [#allocation4], 1 }
 0x196   :  { %431 = vsyncpa [#allocation5], 1 }

</bundles_post_ra>
